<compile_context>
chip_gen: v5e
topology: v5e:2x2
jax: 0.10.0
libtpu: 0.0.40
codegen_flags: <defaults>
</compile_context>

<pallas_src>
import functools

import jax
import jax.numpy as jnp
from jax import lax
from jax.experimental import pallas as pl
from jax.experimental.pallas import tpu as pltpu

EPS = 1e-5
_TARGET_INPUT_TILE_BYTES = 8 << 20  # aim for multi-MiB input tiles per grid step


def _chip_budgets():
    """Returns (vmem_limit_bytes, tile_working_set_budget_bytes), per TPU generation."""
    vmem_cap = 64 << 20  # conservative default (v7x physical VMEM per TC)
    try:
        info = pltpu.get_tpu_info()
        vmem_cap = int(getattr(info, "vmem_capacity_bytes", vmem_cap))
    except Exception:
        pass
    if vmem_cap <= (64 << 20):
        # v7x-like: 64 MiB physical VMEM -> leave headroom for compiler scratch.
        return 40 << 20, 14 << 20
    # v5e / v6e: 128 MiB VMEM (default scoped limit is only 16/32 MiB -> raise it).
    return 80 << 20, 32 << 20


def _sublane_multiple(dtype):
    # Sublane packing: 8 rows/vreg for 4-byte, 16 for 2-byte, 32 for 1-byte dtypes.
    return {4: 8, 2: 16, 1: 32}.get(jnp.dtype(dtype).itemsize, 8)


def _choose_block_rows(rows, d_pad, dtype, tile_budget):
    """Sublane-aligned row tile sized by bytes against the per-chip VMEM budget."""
    itemsize = jnp.dtype(dtype).itemsize
    sub = _sublane_multiple(dtype)
    # Per-row working set: double-buffered input + double-buffered output in the
    # native dtype plus ~2-3 live f32 intermediates inside the kernel body.
    bytes_per_row = d_pad * (4 * itemsize + 12)
    budget_rows = max(sub, tile_budget // max(bytes_per_row, 1))
    target_rows = max(sub, _TARGET_INPUT_TILE_BYTES // max(d_pad * itemsize, 1))
    block = min(budget_rows, target_rows)
    block = max(sub, (block // sub) * sub)              # sublane-aligned
    rows_rounded = ((rows + sub - 1) // sub) * sub
    block = min(block, rows_rounded)                    # don't tile wider than the problem
    # Guarantee >= 2 grid steps when possible so ("parallel",) actually shards
    # rows across v7x's two TensorCores (free on single-TC v5e/v6e).
    if block >= 2 * sub and (rows + block - 1) // block < 2:
        block = max(sub, ((block // 2) // sub) * sub)
    return block


def _ln_body(x_ref, w_ref, b_ref, o_ref, d_valid):
    """Shared LayerNorm math; b_ref may be None. d_valid is the true feature count."""
    x = x_ref[...].astype(jnp.float32)
    d_pad = x.shape[-1]
    if d_valid == d_pad:
        mean = jnp.mean(x, axis=-1, keepdims=True)
        xc = x - mean
        var = jnp.mean(xc * xc, axis=-1, keepdims=True)
    else:
        # Feature dim was zero-padded to a lane multiple in the wrapper:
        # padded lanes contribute 0 to the sums; mask them out of the centered term.
        inv_d = jnp.float32(1.0 / d_valid)
        mean = jnp.sum(x, axis=-1, keepdims=True) * inv_d
        lane = lax.broadcasted_iota(jnp.int32, x.shape, 1)
        xc = jnp.where(lane < d_valid, x - mean, 0.0)
        var = jnp.sum(xc * xc, axis=-1, keepdims=True) * inv_d
    y = xc * lax.rsqrt(var + EPS) * w_ref[...].astype(jnp.float32)
    if b_ref is not None:
        y = y + b_ref[...].astype(jnp.float32)
    o_ref[...] = y.astype(o_ref.dtype)


def _ln_bias_kernel(x_ref, w_ref, b_ref, o_ref, *, d_valid):
    _ln_body(x_ref, w_ref, b_ref, o_ref, d_valid)


def _ln_nobias_kernel(x_ref, w_ref, o_ref, *, d_valid):
    _ln_body(x_ref, w_ref, None, o_ref, d_valid)


def layer_norm(x, weight, bias=None):
    """LayerNorm over the last dim of x (any leading shape), eps=1e-5, optional bias."""
    orig_shape = x.shape
    D = orig_shape[-1]
    rows = 1
    for s in orig_shape[:-1]:
        rows *= s
    x2 = x.reshape(rows, D)

    # Lane-dense stores: pad feature dim to a multiple of 128 (no-op for
    # production D that is already lane-aligned), mask padded lanes in-kernel.
    d_pad = D if D % 128 == 0 else ((D + 127) // 128) * 128
    if d_pad != D:
        x2 = jnp.pad(x2, ((0, 0), (0, d_pad - D)))

    # Pre-cast params to f32 once (avoids per-grid-step conversion for bf16 params).
    w1 = weight.astype(jnp.float32)
    if d_pad != D:
        w1 = jnp.pad(w1, (0, d_pad - D))
    w2 = w1.reshape(1, d_pad)
    if bias is not None:
        b1 = bias.astype(jnp.float32)
        if d_pad != D:
            b1 = jnp.pad(b1, (0, d_pad - D))
        b2 = b1.reshape(1, d_pad)

    vmem_limit, tile_budget = _chip_budgets()
    block_rows = _choose_block_rows(rows, d_pad, x.dtype, tile_budget)
    # No row padding: the boundary block (if any) is masked by Pallas; its
    # writes to out-of-range rows are dropped and LayerNorm is per-row only.
    grid = (pl.cdiv(rows, block_rows),)

    row_spec = pl.BlockSpec((block_rows, d_pad), lambda i: (i, 0))
    vec_spec = pl.BlockSpec((1, d_pad), lambda i: (0, 0))

    if bias is None:
        kernel = functools.partial(_ln_nobias_kernel, d_valid=D)
        in_specs = [row_spec, vec_spec]
        args = (x2, w2)
    else:
        kernel = functools.partial(_ln_bias_kernel, d_valid=D)
        in_specs = [row_spec, vec_spec, vec_spec]
        args = (x2, w2, b2)

    out = pl.pallas_call(
        kernel,
        out_shape=jax.ShapeDtypeStruct((rows, d_pad), x.dtype),
        grid_spec=pltpu.PrefetchScalarGridSpec(
            num_scalar_prefetch=0,
            grid=grid,
            in_specs=in_specs,
            out_specs=row_spec,
        ),
        compiler_params=pltpu.CompilerParams(
            dimension_semantics=("parallel",),
            vmem_limit_bytes=vmem_limit,
        ),
    )(*args)

    if d_pad != D:
        out = out[:, :D]
    return out.reshape(orig_shape)


def _reference(x, weight, bias=None):
    x32 = x.astype(jnp.float32)
    mean = jnp.mean(x32, axis=-1, keepdims=True)
    var = jnp.mean((x32 - mean) ** 2, axis=-1, keepdims=True)
    y = (x32 - mean) / jnp.sqrt(var + EPS) * weight.astype(jnp.float32)
    if bias is not None:
        y = y + bias.astype(jnp.float32)
    return y.astype(x.dtype)


if __name__ == "__main__":
    key = jax.random.PRNGKey(0)
    kx, kx2, kx3, kw, kb = jax.random.split(key, 5)

    # Shapes consistent with the module usage: batch=2, seq=8, hidden=32.
    B, T, D = 2, 8, 32
    x = jax.random.normal(kx, (B, T, D), dtype=jnp.float32)
    # Deterministic params matching nn.Module.__init__: weight=ones, bias=zeros.
    weight = jnp.ones((D,), dtype=jnp.float32)
    bias = jnp.zeros((D,), dtype=jnp.float32)

    # bias=True path (D=32 exercises the lane-padding + masked-reduction path).
    y = jax.block_until_ready(layer_norm(x, weight, bias))
    assert jnp.allclose(y, _reference(x, weight, bias), atol=2e-5, rtol=2e-5), \
        "bias=True mismatch vs reference"

    # bias=False path (dedicated kernel variant, no zero-bias materialized).
    y_nb = jax.block_until_ready(layer_norm(x, weight, None))
    assert jnp.allclose(y_nb, _reference(x, weight, None), atol=2e-5, rtol=2e-5), \
        "bias=False mismatch vs reference"

    # Non-divisible row count: exercises the masked boundary block (no pad/slice).
    x_odd = jax.random.normal(kx2, (2, 7, D), dtype=jnp.float32)
    y_odd = jax.block_until_ready(layer_norm(x_odd, weight, bias))
    assert jnp.allclose(y_odd, _reference(x_odd, weight, bias), atol=2e-5, rtol=2e-5), \
        "odd-rows mismatch vs reference"

    # Lane-aligned D=128: no feature padding, non-trivial weight/bias.
    D2 = 128
    x_al = jax.random.normal(kx3, (4, 8, D2), dtype=jnp.float32)
    w_al = jax.random.normal(kw, (D2,), dtype=jnp.float32)
    b_al = jax.random.normal(kb, (D2,), dtype=jnp.float32)
    y_al = jax.block_until_ready(layer_norm(x_al, w_al, b_al))
    assert jnp.allclose(y_al, _reference(x_al, w_al, b_al), atol=2e-5, rtol=2e-5), \
        "lane-aligned mismatch vs reference"

    print("KERNEL_OK")
</pallas_src>

<mosaic_0001>
module attributes {stable_mosaic.version = 11 : i64} {
  func.func @_ln_bias_kernel(%arg0: i32, %arg1: memref<8x128xf32, #tpu.memory_space<vmem>>, %arg2: memref<1x128xf32, #tpu.memory_space<vmem>>, %arg3: memref<1x128xf32, #tpu.memory_space<vmem>>, %arg4: memref<8x128xf32, #tpu.memory_space<vmem>>) attributes {dimension_semantics = [#tpu.dimension_semantics<parallel>], iteration_bounds = array<i64: 2>, scalar_prefetch = 0 : i64, scratch_operands = 0 : i64, tpu.core_type = #tpu.core_type<tc>, window_params = [{transform_indices = @transform_0, window_bounds = array<i64: 8, 128>}, {pipeline_mode = #tpu.pipeline_mode<synchronous>, transform_indices = @transform_1, window_bounds = array<i64: 1, 128>}, {pipeline_mode = #tpu.pipeline_mode<synchronous>, transform_indices = @transform_2, window_bounds = array<i64: 1, 128>}, {transform_indices = @transform_3, window_bounds = array<i64: 8, 128>}]} {
    %c0 = arith.constant 0 : index
    %c0_0 = arith.constant 0 : index
    %0 = vector.load %arg1[%c0, %c0_0] : memref<8x128xf32, #tpu.memory_space<vmem>>, vector<8x128xf32>
    %cst = arith.constant dense<0.000000e+00> : vector<8xf32>
    %1 = vector.multi_reduction <add>, %0, %cst [1] : vector<8x128xf32> to vector<8xf32>
    %2 = vector.shape_cast %1 : vector<8xf32> to vector<8x1xf32>
    %cst_1 = arith.constant 3.125000e-02 : f32
    %3 = vector.broadcast %cst_1 : f32 to vector<8x1xf32>
    %4 = arith.mulf %2, %3 : vector<8x1xf32>
    %5 = tpu.iota {dimensions = array<i32: 1>} : vector<8x128xi32>
    %c32_i32 = arith.constant 32 : i32
    %6 = vector.broadcast %c32_i32 : i32 to vector<8x128xi32>
    %7 = arith.cmpi slt, %5, %6 : vector<8x128xi32>
    %8 = vector.broadcast %4 : vector<8x1xf32> to vector<8x128xf32>
    %9 = arith.subf %0, %8 : vector<8x128xf32>
    %cst_2 = arith.constant 0.000000e+00 : f32
    %10 = vector.broadcast %cst_2 : f32 to vector<8x128xf32>
    %11 = arith.select %7, %9, %10 : vector<8x128xi1>, vector<8x128xf32>
    %12 = arith.mulf %11, %11 : vector<8x128xf32>
    %cst_3 = arith.constant dense<0.000000e+00> : vector<8xf32>
    %13 = vector.multi_reduction <add>, %12, %cst_3 [1] : vector<8x128xf32> to vector<8xf32>
    %14 = vector.shape_cast %13 : vector<8xf32> to vector<8x1xf32>
    %cst_4 = arith.constant 3.125000e-02 : f32
    %15 = vector.broadcast %cst_4 : f32 to vector<8x1xf32>
    %16 = arith.mulf %14, %15 : vector<8x1xf32>
    %cst_5 = arith.constant 9.99999974E-6 : f32
    %17 = vector.broadcast %cst_5 : f32 to vector<8x1xf32>
    %18 = arith.addf %16, %17 : vector<8x1xf32>
    %19 = math.rsqrt %18 : vector<8x1xf32>
    %20 = vector.broadcast %19 : vector<8x1xf32> to vector<8x128xf32>
    %21 = arith.mulf %11, %20 : vector<8x128xf32>
    %c0_6 = arith.constant 0 : index
    %c0_7 = arith.constant 0 : index
    %22 = vector.load %arg2[%c0_6, %c0_7] : memref<1x128xf32, #tpu.memory_space<vmem>>, vector<1x128xf32>
    %23 = vector.broadcast %22 : vector<1x128xf32> to vector<8x128xf32>
    %24 = arith.mulf %21, %23 : vector<8x128xf32>
    %c0_8 = arith.constant 0 : index
    %c0_9 = arith.constant 0 : index
    %25 = vector.load %arg3[%c0_8, %c0_9] : memref<1x128xf32, #tpu.memory_space<vmem>>, vector<1x128xf32>
    %26 = vector.broadcast %25 : vector<1x128xf32> to vector<8x128xf32>
    %27 = arith.addf %24, %26 : vector<8x128xf32>
    %c0_10 = arith.constant 0 : index
    %c0_11 = arith.constant 0 : index
    %28 = vector.load %arg4[%c0_10, %c0_11] : memref<8x128xf32, #tpu.memory_space<vmem>>, vector<8x128xf32>
    tpu.vector_store %arg4[%c0_10, %c0_11], %27 {strides = array<i32>} : memref<8x128xf32, #tpu.memory_space<vmem>>, vector<8x128xf32>,
    return
  }
  func.func @transform_0(%arg0: i32) -> (i32, i32) {
    %c0_i32 = arith.constant 0 : i32
    %c0_i32_0 = arith.constant 0 : i32
    return %arg0, %c0_i32 : i32, i32
  }
  func.func @transform_1(%arg0: i32) -> (i32, i32) {
    %c0_i32 = arith.constant 0 : i32
    %c0_i32_0 = arith.constant 0 : i32
    %c0_i32_1 = arith.constant 0 : i32
    return %c0_i32, %c0_i32_0 : i32, i32
  }
  func.func @transform_2(%arg0: i32) -> (i32, i32) {
    %c0_i32 = arith.constant 0 : i32
    %c0_i32_0 = arith.constant 0 : i32
    %c0_i32_1 = arith.constant 0 : i32
    return %c0_i32, %c0_i32_0 : i32, i32
  }
  func.func @transform_3(%arg0: i32) -> (i32, i32) {
    %c0_i32 = arith.constant 0 : i32
    %c0_i32_0 = arith.constant 0 : i32
    return %arg0, %c0_i32 : i32, i32
  }
}

</mosaic_0001>

<bundles_post_ra>
// kernel: tpu_custom_call.1
= control target key start
LH: loop header
LB: loop body
LE: loop exit
PB: predicated region body
PF: predicated region fallthrough
CT: control target
= control target key end

     0   :  { %8 = vsyncpa [#allocation3], 0  ;;  %s708_s0 = inlined_call_operand.hbm [shape: f32[16,128], index: 0, kind: input, shape index: {}]   ;;  %s709_s1 = inlined_call_operand.hbm [shape: f32[1,128], index: 1, kind: input, shape index: {}]   ;;  %s710_s2 = inlined_call_operand.vmem [shape: f32[1,128], index: 2, kind: input, shape index: {}]   ;;  %s711_s3 = inlined_call_operand.hbm [shape: f32[16,128], index: 3, kind: output, shape index: {}]  }
   0x1   :  { %10 = vsyncpa [#allocation3 + $0x1], 0 }
   0x2   :  { %11 = vsyncpa [#allocation6], 0 }
   0x3   :  { %12 = vsyncpa [#allocation4], 0 }
   0x4   :  { %14 = vsyncpa [#allocation4 + $0x1], 0  ;;  %s563_s12 = smov 0   ;;  %s565_s13 = smov 0  }
   0x5   :  { %s567_s14 = smov 0   ;;  %s569_s15 = smov 0  }
   0x6 LB: > { %s584_s16 = sadd.s32 4294967295, %s540_s15   ;;  %s335_s17 = sadd.s32 4294967294, %s540_s15   ;;  %s540_s15 = sphi %s569_s15, %s721_s15   ;;  %s536_s14 = sphi %s567_s14, %s720_s14   ;;  %s532_s13 = sphi %s565_s13, %s719_s13   ;;  %s528_s12 = sphi %s563_s12, %s718_s12  }
   0x7   : > { %p40_p0 = scmp.ne.s32.totalorder %s532_s13, %s528_s12  ;;  %p41_p1 = scmp.eq.s32.totalorder %s584_s16, 0 }
   0x8   : > { %p106_p2 = scmp.eq.s32.totalorder %s584_s16, 1  ;;  %p112_p3 = scmp.eq.s32.totalorder %s335_s17, 1 }
   0x9   : > { %p593_p4 = por %p41_p1, %p40_p0  ;;  %p336_p5 = scmp.ge.s32.totalorder %s540_s15, 1 }
   0xa   : > { %p598_p6 = por %p112_p3, %p40_p0  ;;  %p119_p7 = scmp.lt.s32.totalorder %s540_s15, 3 }
   0xb   : > { %s131_s22 = sshll.u32 %s709_s1, 4  ;;  %s542_s24 = smov [#allocation5]   ;;  %s132_s22 = int_to_ptr.hbm [resolvable:$true] %s131_s22 }
   0xc   : > { %p606_p8 = pnand %p336_p5, %p119_p7  ;;  %s133_s25 = sshll.u32 %s542_s24, 4  ;;  %s134_s25 = int_to_ptr.vmem [resolvable:$true] %s133_s25 }
   0xd   : > { %s616_s26 = sadd.s32 1, %s540_s15   ;;  %s27_s27 = sadd.s32 1, %s536_s14 }
   0xe   : > { %p357_p10 = pneg %p606_p8  ;;  %s24_s28 = ssub.s32 %s540_s15, %s616_s26 }
   0xf   : > { %p25_p12 = scmp.eq.s32.totalorder %s24_s28, 0  ;;  %p34_p13 = scmp.ne.s32.totalorder %s536_s14, %s532_s13 }
  0x10   : > { %p358_p11 = pnand %p357_p10, %p41_p1  ;;  %p35_p0 = scmp.eq.s32.totalorder %s540_s15, 0 }
  0x11   : > { %s625_s29 = scalar_select %p25_p12, %s536_s14, %s27_s27  }
  0x12   : > { %360 = dma.hbm_to_vmem [thread:$0]  (!%p358_p11), %s132_s22, 16, %s134_s25, [#allocation6]  }
  0x13   : > { %p629_p3 = por %p106_p2, %p34_p13  ;;  %p370_p5 = scmp.lt.s32.totalorder %s540_s15, 2 }
  0x14   : > { %s147_s4 = sand.u32 1, %s536_s14   ;;  %s340_s5 = sshll.u32 %s540_s15, 3 }
  0x15   : > { %p36_p7 = por %p35_p0, %p34_p13  ;;  %s339_s6 = sshll.u32 %s147_s4, 3 }
  0x16   : > { %s155_s9 = scalar_lea.hbm %s708_s0, %s340_s5  ;;  %s151_s11 = scalar_lea.vmem [#allocation2], %s339_s6 }
  0x17   : > { %s157_s10 = sshll.u32 %s155_s9, 4  ;;  %s159_s17 = sshll.u32 %s151_s11, 4  ;;  %s158_s10 = int_to_ptr.hbm [resolvable:$true] %s157_s10  ;;  %s160_s17 = int_to_ptr.vmem [resolvable:$true] %s159_s17 }
  0x18   : > { %p639_p10 = pnand %p370_p5, %p36_p7  ;;  %s148_s21 = scalar_lea.sflag [#allocation3], %s147_s4 }
  0x19   : > { %s440_s22 = sshra.s32 %s158_s10, 4  ;;  %s447_s28 = scalar_lea.hbm %s708_s0, 16  ;;  %s441_s22 = int_to_ptr.hbm [resolvable:$true] %s440_s22 }
  0x1a   : > { %s442_s24 = scalar_lea.hbm %s441_s22, 8  ;;  %p444_p11 = pneg %p639_p10 }
  0x1b   : > { %p443_p2 = scmp.ne.s32.totalorder %s441_s22, %s442_s24  ;;  %p448_p0 = scmp.lt.s32.totalorder %s441_s22, %s708_s0 }
  0x1c   : > { %p449_p5 = scmp.lt.s32.totalorder %s447_s28, %s442_s24 }
  0x1d   : > { %p445_p12 = pnand %p444_p11, %p443_p2 }
  0x1e   : > { %p450_p7 = por %p449_p5, %p448_p0 }
  0x1f   : > { %p446_p13 = pneg %p445_p12 }
  0x21   : > { %p451_p9 = pnand %p450_p7, %p446_p13 }
  0x23   : > { %454 = shalt.err (!%p451_p9)
}
  0x24   : > { %364 = dma.hbm_to_vmem [thread:$0]  (!%p639_p10), %s158_s10, 128, %s160_s17, %s148_s21  }
  0x25   : > { %168 = sbr.rel (%p606_p8) target bundleno = 316 (0x13c), region = 32  ;;  %s656_s4 = sand.u32 (!%p606_p8), 1, %s532_s13  }
  0x26   : > { %s342_s7 = sshll.u32 (!%p606_p8), %s656_s4, 3  ;;  %s171_s8 = scalar_lea.sflag (!%p606_p8), [#allocation3], %s656_s4 }
  0x27   : > { %s174_s9 = scalar_lea.vmem (!%p606_p8), [#allocation2], %s342_s7 }
  0x2a   : > { %515 = dma.done.wait (%p593_p4), %s171_s8, 128  }
  0x2b   : > { %517 = vsyncadd (%p593_p4), %s171_s8, 4294967168 }
  0x2c   : > { %519 = dma.done.wait (%p41_p1), [#allocation6], 16  }
  0x2d   : > { %521 = vsyncadd (%p41_p1), [#allocation6], 4294967280  ;;  %v203_v0 = vld [vmem:[%s174_s9] sm:$0xff]  ;;  %v207_v1 = vlaneseq  ;;  %s346_s18 = sshll.u32 %s584_s16, 3  ;;  %v406_v17 = vld [vmem:[#allocation5] ss:$0 sm:$0xff] }
  0x2e   : > { %204 = vadd.xlane.f32.xlu0 %v203_v0  ;;  %s250_s11 = scalar_lea.hbm %s711_s3, %s346_s18  ;;  %v407_v20 = vld [vmem:[%s710_s2] ss:$0 sm:$0xff]  ;;  %s202_s21 = scalar_lea.vmem [#allocation7], %s342_s7 }
  0x2f   : > { %v208_v2 = vand.u32 127, %v207_v1  ;;  %s252_s22 = sshll.u32 %s202_s21, 4  ;;  %s254_s16 = sshll.u32 %s250_s11, 4  ;;  %s253_s22 = int_to_ptr.vmem [resolvable:$true] %s252_s22  ;;  %s255_s16 = int_to_ptr.hbm [resolvable:$true] %s254_s16 }
  0x30   : > { %s240_s24 = scalar_lea.sflag [#allocation4], %s656_s4  ;;  %s484_s25 = sshra.s32 %s255_s16, 4  ;;  %s485_s25 = int_to_ptr.hbm [resolvable:$true] %s484_s25 }
  0x31   : > { %vm209_vm0 = vcmp.lt.s32.totalorder %v208_v2, 32  ;;  %s486_s27 = scalar_lea.hbm %s485_s25, 8  ;;  %s490_s6 = scalar_lea.hbm %s711_s3, 16 }
  0x32   : > { %p487_p1 = scmp.ne.s32.totalorder %s485_s25, %s486_s27  ;;  %p491_p9 = scmp.lt.s32.totalorder %s485_s25, %s711_s3 }
  0x33   : > { %p492_p10 = scmp.lt.s32.totalorder %s490_s6, %s486_s27 }
  0x34   : > { %p488_p4 = pnand %p487_p1, %p629_p3 }
  0x35   : > { %p493_p2 = por %p492_p10, %p491_p9 }
  0x36   : > { %p489_p8 = pneg %p488_p4 }
  0x38   : > { %p494_p11 = pnand %p493_p2, %p489_p8 }
  0xa1   : > { %v205_v3 = vpop.xlane.xlu0 %204 }
  0xa2   : > { %v206_v4 = vmul.f32 0.03125, %v205_v3 }
  0xa4   : > { %v210_v5 = vsub.f32 %v203_v0, %v206_v4 }
  0xa6   : > { %v211_v6 = vsel %vm209_vm0, %v210_v5, 0.0 }
  0xa7   : > { %v212_v7 = vmul.f32 %v211_v6, %v211_v6 }
  0xa9   : > { %213 = vadd.xlane.f32.xlu0 %v212_v7 }
 0x11c   : > { %v214_v8 = vpop.xlane.xlu0 %213 }
 0x11d   : > { %v215_v9 = vmul.f32 0.03125, %v214_v8 }
 0x11f   : > { %v216_v10 = vadd.f32 1e-05, %v215_v9 }
 0x121   : > { %408 = vrsqrt.f32 %v216_v10  ;;  %vm223_vm2 = vweird.f32 %v216_v10 }
 0x127   : > { %v409_v11 = vpop.eup %408 }
 0x128   : > { %v218_v12 = vmul.f32 %v409_v11, %v216_v10  ;;  %vm224_vm1 = vweird.f32 %v409_v11 }
 0x129   : > { %vm225_vm3 = vmor %vm223_vm2, %vm224_vm1 }
 0x12a   : > { %v219_v13 = vmul.f32 %v409_v11, %v218_v12 }
 0x12c   : > { %v220_v14 = vmul.f32 0.5, %v219_v13 }
 0x12e   : > { %v221_v15 = vsub.f32 1.5, %v220_v14 }
 0x130   : > { %v222_v16 = vmul.f32 %v409_v11, %v221_v15 }
 0x132   : > { %v226_v18 = vsel %vm225_vm3, %v409_v11, %v222_v16 }
 0x133   : > { %v227_v19 = vmul.f32 %v226_v18, %v211_v6 }
 0x135   : > { %v232_v21 = vmul.f32 %v406_v17, %v227_v19 }
 0x137   : > { %v237_v22 = vadd.f32 %v407_v20, %v232_v21 }
 0x139   : > { %238 = vst [vmem:[%s202_s21] sm:$0xff] %v237_v22 }
 0x13a   : > { %497 = shalt.err (!%p494_p11)
}
 0x13b   : > { %355 = dma.vmem_to_hbm [thread:$0]  (%p629_p3), %s253_s22, 128, %s255_s16, %s240_s24  }
 0x13c PF: > { %s266_s4 = sand.u32 1, %s528_s12   ;;  %p717_p12 = scmp.ge.s32.totalorder %s540_s15, 2 }
 0x13d   : > { %s267_s9 = scalar_lea.sflag [#allocation4], %s266_s4 }
 0x13e   : > { %p366_p13 = pnand %p717_p12, %p598_p6 }
 0x140   : > { %p367_p0 = pneg %p366_p13 }
 0x142   : > { %523 = dma.done.wait (%p367_p0), %s267_s9, 128  }
 0x143   : > { %525 = vsyncadd (%p367_p0), %s267_s9, 4294967168  ;;  %p17_p5 = scmp.ge.s32.totalorder %s616_s26, 4   ;;  %s718_s12 = smov %s532_s13 }
 0x144   : > { %s719_s13 = smov %s536_s14  ;;  %s720_s14 = smov %s625_s29 }
 0x145   : > { %s721_s15 = smov %s616_s26  ;;  %19 = sbr.rel (!%p17_p5) target bundleno = 6 (0x6), region = 81 }
 0x14a   :  { %273 = vsyncpa [#allocation3], 1 }
 0x14b   :  { %275 = vsyncpa [#allocation3 + $0x1], 1 }
 0x14c   :  { %276 = vsyncpa [#allocation6], 1 }
 0x14d   :  { %277 = vsyncpa [#allocation4], 1 }
 0x14e   :  { %279 = vsyncpa [#allocation4 + $0x1], 1 }

</bundles_post_ra>
